<compile_context>
chip_gen: v7x
topology: tpu7x:2x2x1
jax: 0.10.0
libtpu: 0.0.40
codegen_flags: <defaults>
</compile_context>

<pallas_src>
import jax
import jax.numpy as jnp
from jax.experimental import pallas as pl
from jax.experimental.pallas import tpu as pltpu


def pointnet_kernel(x_ref, w_ref, shift_ref, o_ref):
    # x_ref:     (1, C_in, TN)  bf16  one point tile of one batch element (channels-first)
    # w_ref:     (C_out, C_in)  bf16  conv1d(k=1) weight with BN scale folded in
    # shift_ref: (C_out, 1)     f32   folded BN shift (beta - mean * scale)
    # o_ref:     (1, C_out, 1)  f32   per-batch max-pooled features; block index is
    #                                 constant along the point axis -> VMEM-resident,
    #                                 used directly as the running-max accumulator.
    n = pl.program_id(1)

    y = jnp.dot(w_ref[...], x_ref[0],
                preferred_element_type=jnp.float32)     # (C_out, TN)  MXU, f32 acc
    y = jnp.maximum(y + shift_ref[...], 0.0)            # BN shift + ReLU (f32, VPU)
    tile_max = y.max(axis=1, keepdims=True)             # (C_out, 1)   XLU lane reduce

    @pl.when(n == 0)
    def _():
        o_ref[0] = tile_max

    @pl.when(n > 0)
    def _():
        o_ref[0] = jnp.maximum(o_ref[0], tile_max)


def _choose_point_tile(n_points, max_tile=2048):
    """Whole point axis if it fits, else the largest 128-multiple divisor <= max_tile."""
    if n_points <= max_tile:
        return n_points
    t = (max_tile // 128) * 128
    while t >= 128:
        if n_points % t == 0:
            return t
        t -= 128
    return n_points  # no aligned divisor: fall back to a single tile over the axis


def pointnet_forward(features, conv_w, gamma, beta, running_mean, running_var,
                     eps=1e-5, *, max_tile=2048, stream_dtype=jnp.bfloat16):
    """features: (B, N, 9) f32/bf16 -> (64, B) f32, matching PointNet.forward (eval BN)."""
    B, N, C_in = features.shape
    C_out = conv_w.shape[0]

    # Fold eval-mode BatchNorm into the k=1 conv:  y = (w * scale) @ x + shift.
    # TODO(synk): training-mode BN (batch statistics) is not implemented; eval-mode
    # running-stats affine is folded instead.
    scale = gamma / jnp.sqrt(running_var + eps)                    # (C_out,)
    w_folded = (conv_w * scale[:, None]).astype(stream_dtype)      # (C_out, C_in)
    shift = (beta - running_mean * scale).astype(jnp.float32)
    shift = shift.reshape(C_out, 1)                                # (C_out, 1)

    # Same permute(0,2,1).contiguous() the PyTorch module performs, fused with the
    # bf16 down-cast: the kernel then streams half the bytes, lane-dense along points.
    x = jnp.transpose(features, (0, 2, 1)).astype(stream_dtype)    # (B, C_in, N)

    tn = _choose_point_tile(N, max_tile)
    assert N % tn == 0, "point count must be divisible by the chosen point tile"
    nt = N // tn

    out = pl.pallas_call(
        pointnet_kernel,
        out_shape=jax.ShapeDtypeStruct((B, C_out, 1), jnp.float32),
        grid_spec=pltpu.PrefetchScalarGridSpec(
            num_scalar_prefetch=0,
            grid=(B, nt),                 # batch parallel, point (reduction) axis last
            in_specs=[
                pl.BlockSpec((1, C_in, tn), lambda b, n: (b, 0, n)),
                pl.BlockSpec((C_out, C_in), lambda b, n: (0, 0)),
                pl.BlockSpec((C_out, 1), lambda b, n: (0, 0)),
            ],
            out_specs=pl.BlockSpec((1, C_out, 1), lambda b, n: (b, 0, 0)),
        ),
        compiler_params=pltpu.CompilerParams(
            # B "parallel" lets v7x megacore split batches across its two TensorCores.
            # (For B == 1, split the point axis over a leading size-2 parallel axis and
            #  combine the two partial maxes in the wrapper.)
            dimension_semantics=("parallel", "arbitrary"),
            # Explicit VMEM budget: a (C_in, tn) bf16 tile is ~32*tn bytes per buffer,
            # so even tn=2048 double-buffered stays in the low hundreds of KiB —
            # comfortably inside this limit on v5e / v6e / v7x.
            vmem_limit_bytes=32 * 1024 * 1024,
        ),
    )(x, w_folded, shift)

    return out[:, :, 0].T          # (C_out, B) -- matches the torch module's x_max


def reference_forward(features, conv_w, gamma, beta, running_mean, running_var,
                      eps=1e-5, compute_dtype=jnp.float32):
    """Pure-JAX reference with identical semantics (optionally at the same bf16 precision)."""
    scale = gamma / jnp.sqrt(running_var + eps)
    w_folded = (conv_w * scale[:, None]).astype(compute_dtype)     # (C_out, C_in)
    shift = beta - running_mean * scale                            # (C_out,)
    x = features.astype(compute_dtype)                             # (B, N, C_in)
    y = jnp.einsum("bnc,oc->bno", x, w_folded,
                   preferred_element_type=jnp.float32)             # conv1d k=1
    y = jnp.maximum(y + shift, 0.0)                                # BN shift + ReLU
    return jnp.max(y, axis=1).T                                    # (C_out, B)


if __name__ == "__main__":
    B, N, C_IN, C_OUT = 2, 128, 9, 64
    key = jax.random.PRNGKey(0)
    k_feat, k_w, k_g, k_b, k_m, k_v = jax.random.split(key, 6)

    # Deterministic synthetic inputs / parameters.
    # Conv1d(9 -> 64, kernel_size=1, bias=False).weight has shape (64, 9, 1); we use (64, 9).
    features = jax.random.normal(k_feat, (B, N, C_IN), dtype=jnp.float32)
    conv_w = 0.1 * jax.random.normal(k_w, (C_OUT, C_IN), dtype=jnp.float32)

    # BatchNorm1d(64) eval-mode parameters (running stats), eps = 1e-5.
    gamma = 1.0 + 0.1 * jax.random.normal(k_g, (C_OUT,), dtype=jnp.float32)
    beta = 0.1 * jax.random.normal(k_b, (C_OUT,), dtype=jnp.float32)
    running_mean = 0.1 * jax.random.normal(k_m, (C_OUT,), dtype=jnp.float32)
    running_var = 1.0 + 0.1 * jax.random.uniform(k_v, (C_OUT,), dtype=jnp.float32)
    eps = 1e-5

    out = jax.block_until_ready(
        pointnet_forward(features, conv_w, gamma, beta, running_mean, running_var, eps=eps))
    assert out.shape == (C_OUT, B), out.shape

    # Strict check against a reference computed at the same (bf16-stream, f32-acc) precision.
    ref_bf16 = reference_forward(features, conv_w, gamma, beta, running_mean, running_var,
                                 eps=eps, compute_dtype=jnp.bfloat16)
    assert jnp.allclose(out, ref_bf16, atol=1e-3, rtol=1e-3), "mismatch vs bf16 reference"

    # Loose sanity check against the full-f32 reference (bounds the bf16 streaming error).
    ref_f32 = reference_forward(features, conv_w, gamma, beta, running_mean, running_var,
                                eps=eps, compute_dtype=jnp.float32)
    assert jnp.allclose(out, ref_f32, atol=5e-2, rtol=5e-2), "mismatch vs f32 reference"

    print("KERNEL_OK")
</pallas_src>

<mosaic_0001>
module attributes {stable_mosaic.version = 11 : i64} {
  func.func @pointnet_kernel(%arg0: i32, %arg1: i32, %arg2: memref<1x9x128xbf16, #tpu.memory_space<vmem>>, %arg3: memref<64x9xbf16, #tpu.memory_space<vmem>>, %arg4: memref<64x1xf32, #tpu.memory_space<vmem>>, %arg5: memref<1x64x1xf32, #tpu.memory_space<vmem>>) attributes {dimension_semantics = [#tpu.dimension_semantics<parallel>, #tpu.dimension_semantics<arbitrary>], iteration_bounds = array<i64: 2, 1>, scalar_prefetch = 0 : i64, scratch_operands = 0 : i64, tpu.core_type = #tpu.core_type<tc>, window_params = [{transform_indices = @transform_0, window_bounds = array<i64: 1, 9, 128>}, {pipeline_mode = #tpu.pipeline_mode<synchronous>, transform_indices = @transform_1, window_bounds = array<i64: 64, 9>}, {pipeline_mode = #tpu.pipeline_mode<synchronous>, transform_indices = @transform_2, window_bounds = array<i64: 64, 1>}, {transform_indices = @transform_3, window_bounds = array<i64: 1, 64, 1>}]} {
    %c0 = arith.constant 0 : index
    %c0_0 = arith.constant 0 : index
    %0 = vector.load %arg3[%c0, %c0_0] : memref<64x9xbf16, #tpu.memory_space<vmem>>, vector<64x9xbf16>
    %c0_1 = arith.constant 0 : index
    %c0_2 = arith.constant 0 : index
    %c0_3 = arith.constant 0 : index
    %1 = vector.load %arg2[%c0_1, %c0_2, %c0_3] : memref<1x9x128xbf16, #tpu.memory_space<vmem>>, vector<1x9x128xbf16>
    %2 = vector.shape_cast %1 : vector<1x9x128xbf16> to vector<9x128xbf16>
    %cst = arith.constant dense<0.000000e+00> : vector<64x128xf32>
    %3 = tpu.matmul %0, %2, %cst {dimension_numbers = #tpu.dot_dimension_numbers<[1], [0], [0], [1], [0, 0, 1, 1], [], []>} : vector<64x9xbf16>, vector<9x128xbf16>, vector<64x128xf32> -> vector<64x128xf32>
    %c0_4 = arith.constant 0 : index
    %c0_5 = arith.constant 0 : index
    %4 = vector.load %arg4[%c0_4, %c0_5] : memref<64x1xf32, #tpu.memory_space<vmem>>, vector<64x1xf32>
    %5 = vector.broadcast %4 : vector<64x1xf32> to vector<64x128xf32>
    %6 = arith.addf %3, %5 : vector<64x128xf32>
    %cst_6 = arith.constant 0.000000e+00 : f32
    %7 = vector.broadcast %cst_6 : f32 to vector<64x128xf32>
    %8 = arith.maximumf %6, %7 : vector<64x128xf32>
    %cst_7 = arith.constant dense<0xFF800000> : vector<64xf32>
    %9 = vector.multi_reduction <maximumf>, %8, %cst_7 [1] : vector<64x128xf32> to vector<64xf32>
    %10 = vector.shape_cast %9 : vector<64xf32> to vector<64x1xf32>
    %c0_i32 = arith.constant 0 : i32
    %11 = arith.cmpi eq, %arg1, %c0_i32 : i32
    %12 = arith.extui %11 : i1 to i32
    %c0_i32_8 = arith.constant 0 : i32
    %13 = arith.cmpi ne, %12, %c0_i32_8 : i32
    scf.if %13 {
      %c0_11 = arith.constant 0 : index
      %c0_12 = arith.constant 0 : index
      %c0_13 = arith.constant 0 : index
      %17 = vector.load %arg5[%c0_11, %c0_12, %c0_13] : memref<1x64x1xf32, #tpu.memory_space<vmem>>, vector<1x64x1xf32>
      %18 = vector.shape_cast %17 : vector<1x64x1xf32> to vector<64x1xf32>
      %19 = vector.shape_cast %10 : vector<64x1xf32> to vector<1x64x1xf32>
      tpu.vector_store %arg5[%c0_11, %c0_12, %c0_13], %19 {strides = array<i32>} : memref<1x64x1xf32, #tpu.memory_space<vmem>>, vector<1x64x1xf32>,
    } else {
    }
    %c0_i32_9 = arith.constant 0 : i32
    %14 = arith.cmpi sgt, %arg1, %c0_i32_9 : i32
    %15 = arith.extui %14 : i1 to i32
    %c0_i32_10 = arith.constant 0 : i32
    %16 = arith.cmpi ne, %15, %c0_i32_10 : i32
    scf.if %16 {
      %c0_11 = arith.constant 0 : index
      %c0_12 = arith.constant 0 : index
      %c0_13 = arith.constant 0 : index
      %17 = vector.load %arg5[%c0_11, %c0_12, %c0_13] : memref<1x64x1xf32, #tpu.memory_space<vmem>>, vector<1x64x1xf32>
      %18 = vector.shape_cast %17 : vector<1x64x1xf32> to vector<64x1xf32>
      %19 = arith.maximumf %18, %10 : vector<64x1xf32>
      %c0_14 = arith.constant 0 : index
      %c0_15 = arith.constant 0 : index
      %c0_16 = arith.constant 0 : index
      %20 = vector.load %arg5[%c0_14, %c0_15, %c0_16] : memref<1x64x1xf32, #tpu.memory_space<vmem>>, vector<1x64x1xf32>
      %21 = vector.shape_cast %20 : vector<1x64x1xf32> to vector<64x1xf32>
      %22 = vector.shape_cast %19 : vector<64x1xf32> to vector<1x64x1xf32>
      tpu.vector_store %arg5[%c0_14, %c0_15, %c0_16], %22 {strides = array<i32>} : memref<1x64x1xf32, #tpu.memory_space<vmem>>, vector<1x64x1xf32>,
    } else {
    }
    return
  }
  func.func @transform_0(%arg0: i32, %arg1: i32) -> (i32, i32, i32) {
    %c0_i32 = arith.constant 0 : i32
    %c0_i32_0 = arith.constant 0 : i32
    return %arg0, %c0_i32, %arg1 : i32, i32, i32
  }
  func.func @transform_1(%arg0: i32, %arg1: i32) -> (i32, i32) {
    %c0_i32 = arith.constant 0 : i32
    %c0_i32_0 = arith.constant 0 : i32
    %c0_i32_1 = arith.constant 0 : i32
    return %c0_i32, %c0_i32_0 : i32, i32
  }
  func.func @transform_2(%arg0: i32, %arg1: i32) -> (i32, i32) {
    %c0_i32 = arith.constant 0 : i32
    %c0_i32_0 = arith.constant 0 : i32
    %c0_i32_1 = arith.constant 0 : i32
    return %c0_i32, %c0_i32_0 : i32, i32
  }
  func.func @transform_3(%arg0: i32, %arg1: i32) -> (i32, i32, i32) {
    %c0_i32 = arith.constant 0 : i32
    %c0_i32_0 = arith.constant 0 : i32
    %c0_i32_1 = arith.constant 0 : i32
    return %arg0, %c0_i32, %c0_i32_0 : i32, i32, i32
  }
}

</mosaic_0001>

<bundles_post_ra>
// kernel: tpu_custom_call.1
= control target key start
LH: loop header
LB: loop body
LE: loop exit
PB: predicated region body
PF: predicated region fallthrough
CT: control target
= control target key end

     0   :  { %s616_s12 = smov 0   ;;  %s618_s13 = smov 0   ;;  %s701_s0 = inlined_call_operand.vmem [shape: bf16[2,9,128], index: 0, kind: input, shape index: {}]   ;;  %s702_s1 = inlined_call_operand.vmem [shape: bf16[64,9], index: 1, kind: input, shape index: {}]   ;;  %s703_s2 = inlined_call_operand.vmem [shape: f32[64,1], index: 2, kind: input, shape index: {}]   ;;  %s704_s3 = inlined_call_operand.vmem [shape: f32[2,64,1], index: 3, kind: output, shape index: {}]  }
   0x1   :  { %s620_s14 = smov 0  }
   0x2 LB: > { %s25_s15 = sadd.s32 1, %s588_s13  ;;  %p502_p0 = scmp.ge.s32.totalorder %s592_s14, 1  ;;  %s592_s14 = sphi %s620_s14, %s13_s14   ;;  %s588_s13 = sphi %s618_s13, %s706_s13   ;;  %s584_s12 = sphi %s616_s12, %s705_s12  }
   0x3   : > { %p27_p1 = scmp.ge.s32.totalorder %s25_s15, 2  ;;  %p154_p2 = scmp.lt.s32.totalorder %s592_s14, 3 }
   0x5   : > { %s708_s15 = smov (%p27_p1, %s25_s15), 0  ;;  %p155_p3 = pnand %p502_p0, %p154_p2 }
   0x6   : > { %p181_p4 = scmp.lt.s32.totalorder (!%p155_p3), %s584_s12, 1  ;;  %vm291_vm0 = vcmask (!%p155_p3), 1043456   ;;  %vm292_vm1 = vcmask (!%p155_p3), 1044480   ;;  %v566_v0 = vld [vmem:[%s702_s1] sm:$0xff] (!%p155_p3)   ;;  %vm278_vm2 = vcmask (!%p155_p3), 72704   ;;  %v567_v1 = vld [vmem:[%s702_s1 + $0x10] sm:$0xff] (!%p155_p3)  }
   0x7   : > { %158 = sbr.rel (%p155_p3) target bundleno = 399 (0x18f), region = 32  ;;  %v594_v2 = vmov (!%p155_p3), 65535   ;;  %527 = vmatprep.mubr.msk.bf16.mxu0 (!%p155_p3), %vm278_vm2, %v566_v0  ;;  %531 = vmatprep.mubr.msk.bf16.mxu1 (!%p155_p3), %vm278_vm2, %v567_v1  ;;  %v595_v4 = vmov (!%p155_p3), 0   ;;  %v207_v6 = vld [vmem:[%s703_s2 + $0x10] sm:$0xff] (!%p155_p3)  ;;  %v205_v7 = vld [vmem:[%s703_s2] sm:$0xff] (!%p155_p3)  ;;  %v208_v10 = vld [vmem:[%s703_s2 + $0x18] sm:$0xff] (!%p155_p3) }
   0x8   : > { %v293_v3 = vsel (!%p155_p3), %vm291_vm0, 4294967295, %v594_v2  ;;  %564 = vset.pattern.permute.xlu1 (!%p155_p3), %v595_v4  ;;  %563 = vset.pattern.permute.xlu0 (!%p155_p3), %v595_v4  ;;  %v206_v11 = vld [vmem:[%s703_s2 + $0x8] sm:$0xff] (!%p155_p3)  ;;  %v569_v13 = vld [vmem:[%s702_s1 + $0x18] sm:$0xff] (!%p155_p3)   ;;  %v209_v15 = vld [vmem:[%s703_s2 + $0x20] sm:$0xff] (!%p155_p3)  ;;  %vm391_vm3 = vcmask (!%p155_p3), 7168  }
   0x9   : > { %v294_v5 = vsel (!%p155_p3), %vm292_vm1, %v293_v3, 0  ;;  %225 = vperm.xlu1 (!%p155_p3), %564, %v207_v6   ;;  %215 = vperm.xlu0 (!%p155_p3), %563, %v205_v7   ;;  %v568_v12 = vld [vmem:[%s702_s1 + $0x8] sm:$0xff] (!%p155_p3)   ;;  %v212_v16 = vld [vmem:[%s703_s2 + $0x38] sm:$0xff] (!%p155_p3)  ;;  %v211_v17 = vld [vmem:[%s703_s2 + $0x30] sm:$0xff] (!%p155_p3) }
   0xa   : > { %v210_v14 = vld [vmem:[%s703_s2 + $0x28] sm:$0xff] (!%p155_p3) }
   0xd   : > { %230 = vperm.xlu1 (!%p155_p3), %564, %v208_v10   ;;  %220 = vperm.xlu0 (!%p155_p3), %563, %v206_v11  }
   0xe   : > { %s710_s12 = smov (!%p181_p4, %s584_s12), 1 }
   0xf   : > { %s518_s20 = sshll.u32 %s710_s12, 3  ;;  %s519_s21 = sshll.u32 %s710_s12, 6 }
  0x10   : > { %s188_s23 = scalar_lea.vmem %s701_s0, %s518_s20  ;;  %s193_s24 = scalar_lea.vmem %s704_s3, %s519_s21 }
  0x11   : > { %v565_v8 = vld [vmem:[%s188_s23] sm:$0x1f]   ;;  %240 = vperm.xlu1 %564, %v210_v14   ;;  %235 = vperm.xlu0 %563, %v209_v15  }
  0x12   : > { %v296_v9 = vand.u32 %v565_v8, %v294_v5 }
  0x14   : > { %525 = vmatprep.subr.bf16.mxu0 %v296_v9  ;;  %535 = vmatprep.subr.bf16.mxu1 %v296_v9 }
  0x15   : > { %526 = vmatpush3.bf16.msra.mxu0 %v296_v9  ;;  %536 = vmatpush3.bf16.msra.mxu1 %v296_v9 }
  0x16   : > { %250 = vperm.xlu1 %564, %v212_v16   ;;  %245 = vperm.xlu0 %563, %v211_v17  }
  0x18   : > { %528 = vmatmul.mubr.msk.bf16.vlgmr.msra.gmra.mrb[0].mxu0 %vm278_vm2, %v568_v12  ;;  %532 = vmatmul.mubr.msk.bf16.vlgmr.msra.gmra.mrb[0].mxu1 %vm278_vm2, %v569_v13 }
  0x88   : > { %v216_v18 = vpop.permute.xlu0 %215  ;;  %v226_v19 = vpop.permute.xlu1 %225 }
  0x8c   : > { %v221_v20 = vpop.permute.xlu0 %220  ;;  %v231_v21 = vpop.permute.xlu1 %230 }
  0x90   : > { %v236_v22 = vpop.permute.xlu0 %235  ;;  %v241_v40 = vpop.permute.xlu1 %240 }
  0x95   : > { %v246_v37 = vpop.permute.xlu0 %245  ;;  %v251_v46 = vpop.permute.xlu1 %250 }
  0xeb   : > { %v529_v23 = vpop.f32.mrb[0].mxu0  ;;  %v533_v24 = vpop.f32.mrb[0].mxu1 }
  0xec   : > { %v341_v25 = vadd.f32 %v529_v23, %v226_v19  ;;  %v332_v26 = vpop.f32.mrb[1].mxu0  ;;  %v348_v27 = vpop.f32.mrb[1].mxu1  ;;  %v357_v41 = vadd.f32 %v533_v24, %v246_v37 }
  0xed   : > { %v349_v28 = vadd.f32 %v348_v27, %v236_v22  ;;  %v530_v29 = vpop.f32.mrb[2].mxu0  ;;  %v534_v30 = vpop.f32.mrb[2].mxu1  ;;  %v333_v32 = vadd.f32 %v332_v26, %v216_v18 }
  0xee   : > { %v365_v31 = vmax.f32 %v341_v25, 0.0  ;;  %v335_v33 = vpop.f32.mrb[3].mxu0  ;;  %v351_v34 = vpop.f32.mrb[3].mxu1  ;;  %v344_v39 = vadd.f32 %v530_v29, %v231_v21  ;;  %v369_v45 = vmax.f32 %v357_v41, 0.0  ;;  %v360_v47 = vadd.f32 %v534_v30, %v251_v46 }
  0xef   : > { %v367_v35 = vmax.f32 %v349_v28, 0.0  ;;  %v336_v36 = vadd.f32 %v335_v33, %v221_v20  ;;  %v363_v38 = vmax.f32 %v333_v32, 0.0  ;;  %v352_v44 = vadd.f32 %v351_v34, %v241_v40 }
  0xf0   : > { %375 = vmax.xlane.f32.xlu0 %v365_v31  ;;  %v366_v43 = vmax.f32 %v344_v39, 0.0  ;;  %v370_v49 = vmax.f32 %v360_v47, 0.0 }
  0xf1   : > { %379 = vmax.xlane.f32.xlu1 %v367_v35  ;;  %v364_v42 = vmax.f32 %v336_v36, 0.0  ;;  %v368_v48 = vmax.f32 %v352_v44, 0.0 }
  0xf4   : > { %371 = vmax.xlane.f32.xlu0 %v363_v38 }
  0xf5   : > { %373 = vmax.xlane.f32.xlu1 %v364_v42 }
  0xf8   : > { %377 = vmax.xlane.f32.xlu0 %v366_v43 }
  0xf9   : > { %383 = vmax.xlane.f32.xlu1 %v369_v45 }
  0xfc   : > { %381 = vmax.xlane.f32.xlu0 %v368_v48 }
 0x100   : > { %385 = vmax.xlane.f32.xlu0 %v370_v49 }
 0x17d   : > { %v376_v50 = vpop.xlane.xlu0 %375 }
 0x17e   : > { %394 = vst.msk [vmem:[%s193_s24 + $0x10] sm:$0xff] %vm391_vm3, %v376_v50  ;;  %v380_v51 = vpop.xlane.xlu1 %379 }
 0x17f   : > { %396 = vst.msk [vmem:[%s193_s24 + $0x20] sm:$0xff] %vm391_vm3, %v380_v51 }
 0x181   : > { %v372_v52 = vpop.xlane.xlu0 %371 }
 0x182   : > { %392 = vst.msk [vmem:[%s193_s24] sm:$0xff] %vm391_vm3, %v372_v52  ;;  %v374_v53 = vpop.xlane.xlu1 %373 }
 0x183   : > { %393 = vst.msk [vmem:[%s193_s24 + $0x8] sm:$0xff] %vm391_vm3, %v374_v53 }
 0x185   : > { %v378_v54 = vpop.xlane.xlu0 %377 }
 0x186   : > { %395 = vst.msk [vmem:[%s193_s24 + $0x18] sm:$0xff] %vm391_vm3, %v378_v54  ;;  %v384_v55 = vpop.xlane.xlu1 %383 }
 0x187   : > { %398 = vst.msk [vmem:[%s193_s24 + $0x30] sm:$0xff] %vm391_vm3, %v384_v55 }
 0x189   : > { %v382_v56 = vpop.xlane.xlu0 %381 }
 0x18a   : > { %397 = vst.msk [vmem:[%s193_s24 + $0x28] sm:$0xff] %vm391_vm3, %v382_v56 }
 0x18d   : > { %v386_v57 = vpop.xlane.xlu0 %385 }
 0x18e   : > { %399 = vst.msk [vmem:[%s193_s24 + $0x38] sm:$0xff] %vm391_vm3, %v386_v57 }
 0x18f PF: > { %s13_s14 = sadd.s32 1, %s592_s14   ;;  %s705_s12 = smov %s588_s13 }
 0x190   : > { %p10_p5 = scmp.ge.s32.totalorder %s13_s14, 4   ;;  %s706_s13 = smov %s708_s15 }
 0x192   :  { %12 = sbr.rel (!%p10_p5) target bundleno = 2 (0x2), region = 70 }

</bundles_post_ra>
